<compile_context>
chip_gen: v6e
topology: v6e:2x2x1
jax: 0.10.0
libtpu: 0.0.40
codegen_flags: <defaults>
</compile_context>

<pallas_src>
import jax
import jax.numpy as jnp
from jax.experimental import pallas as pl
from jax.experimental.pallas import tpu as pltpu

B = 8        # batch (demo size; kernel handles any B in one block)
L = 16       # input length (forces 64*3 features at the Flatten, as lin1 expects)
EPS = 1e-5   # BatchNorm eps (torch default)

# rows of the packed vector slab (13, 64)
(RW1, RB1, RB2, RG1, RBE1, RB3, RG2, RBE2, RBL1, RG3, RBE3, RWL2, RBL2) = range(13)

# row offsets of the packed weight slab (272, 64)
W2A, W2B = 0, 8            # conv2 taps, (4, 32) each
W3A, W3B = 16, 48          # conv3 taps, (32, 64) each
WL1_0, WL1_1, WL1_2 = 80, 144, 208   # lin1 per-position blocks, (64, 50) each
W_ROWS = 272


def cnn_kernel(x_ref, w_ref, v_ref, out_ref):
    f32 = jnp.float32
    Bk = x_ref.shape[0] // L      # rows per length position (= batch)

    # ---- conv1 (1 -> 4, k=1) + ReLU : one VPU pass over all 16*B positions ----
    w1 = v_ref[RW1:RW1 + 1, 0:4]                         # (1, 4)
    b1 = v_ref[RB1:RB1 + 1, 0:4]                         # (1, 4)
    h1 = jnp.maximum(x_ref[...] * w1 + b1, 0.0)          # (16B, 4), row = l*B + b

    # ---- conv2 (4 -> 32, k=2): two full-width tap matmuls on the packed array ----
    h2 = (jnp.dot(h1[0:15 * Bk], w_ref[W2A:W2A + 4, 0:32], preferred_element_type=f32)
          + jnp.dot(h1[Bk:16 * Bk], w_ref[W2B:W2B + 4, 0:32], preferred_element_type=f32)
          + v_ref[RB2:RB2 + 1, 0:32])                    # (15B, 32)

    # ---- MaxPool1d(2): pairs (0,1)..(12,13), position 14 dropped ----
    h2p = h2[0:14 * Bk].reshape(7, 2 * Bk, 32)           # lane dim intact -> free reshape
    p1 = jnp.maximum(h2p[:, 0:Bk, :], h2p[:, Bk:2 * Bk, :]).reshape(7 * Bk, 32)

    # ---- BatchNorm1d(32), training stats over (batch, length), single pass, ReLU ----
    inv_n1 = 1.0 / (7 * Bk)
    m1 = jnp.sum(p1, axis=0, keepdims=True) * inv_n1                       # (1,32)
    var1 = jnp.sum(p1 * p1, axis=0, keepdims=True) * inv_n1 - m1 * m1      # (1,32)
    sc1 = jax.lax.rsqrt(var1 + EPS) * v_ref[RG1:RG1 + 1, 0:32]
    q1 = jnp.maximum((p1 - m1) * sc1 + v_ref[RBE1:RBE1 + 1, 0:32], 0.0)    # (7B, 32)

    # ---- conv3 (32 -> 64, k=2): two tap matmuls ----
    h3 = (jnp.dot(q1[0:6 * Bk], w_ref[W3A:W3A + 32, 0:64], preferred_element_type=f32)
          + jnp.dot(q1[Bk:7 * Bk], w_ref[W3B:W3B + 32, 0:64], preferred_element_type=f32)
          + v_ref[RB3:RB3 + 1, 0:64])                    # (6B, 64)

    # ---- AvgPool1d(2) ----
    h3p = h3.reshape(3, 2 * Bk, 64)
    r = ((h3p[:, 0:Bk, :] + h3p[:, Bk:2 * Bk, :]) * 0.5).reshape(3 * Bk, 64)

    # ---- BatchNorm1d(64), training stats, single pass, ReLU ----
    inv_n2 = 1.0 / (3 * Bk)
    m2 = jnp.sum(r, axis=0, keepdims=True) * inv_n2
    var2 = jnp.sum(r * r, axis=0, keepdims=True) * inv_n2 - m2 * m2
    sc2 = jax.lax.rsqrt(var2 + EPS) * v_ref[RG2:RG2 + 1, 0:64]
    s = jnp.maximum((r - m2) * sc2 + v_ref[RBE2:RBE2 + 1, 0:64], 0.0)      # (3B, 64)

    # ---- Flatten (torch order idx = c*3 + l folded into weights) + lin1 ----
    h4 = (jnp.dot(s[0:Bk], w_ref[WL1_0:WL1_0 + 64, 0:50], preferred_element_type=f32)
          + jnp.dot(s[Bk:2 * Bk], w_ref[WL1_1:WL1_1 + 64, 0:50], preferred_element_type=f32)
          + jnp.dot(s[2 * Bk:3 * Bk], w_ref[WL1_2:WL1_2 + 64, 0:50], preferred_element_type=f32)
          + v_ref[RBL1:RBL1 + 1, 0:50])                  # (B, 50)

    # ---- BatchNorm1d(50), training stats over batch, ReLU ----
    inv_b = 1.0 / Bk
    m3 = jnp.sum(h4, axis=0, keepdims=True) * inv_b
    var3 = jnp.sum(h4 * h4, axis=0, keepdims=True) * inv_b - m3 * m3
    sc3 = jax.lax.rsqrt(var3 + EPS) * v_ref[RG3:RG3 + 1, 0:50]
    t = jnp.maximum((h4 - m3) * sc3 + v_ref[RBE3:RBE3 + 1, 0:50], 0.0)     # (B, 50)

    # ---- lin2 (50 -> 1) as a lane reduction ----
    out_ref[...] = (jnp.sum(t * v_ref[RWL2:RWL2 + 1, 0:50], axis=1, keepdims=True)
                    + v_ref[RBL2:RBL2 + 1, 0:1])


@jax.jit
def conv_net_pallas(x, wm, vec):
    Bx, Lx = x.shape
    # Layout plumbing (host side): row l*B + b holds x[b, l] -> conv windows become
    # contiguous 8-aligned row blocks inside the kernel.
    xk = x.T.reshape(Lx * Bx, 1)
    return pl.pallas_call(
        cnn_kernel,
        out_shape=jax.ShapeDtypeStruct((Bx, 1), jnp.float32),
        in_specs=[pl.BlockSpec(memory_space=pltpu.MemorySpace.VMEM)] * 3,
        out_specs=pl.BlockSpec(memory_space=pltpu.MemorySpace.VMEM),
    )(xk, wm, vec)


# --------------------- parameter setup (deterministic, torch shapes) ---------------------
def init_torch_params(key):
    ks = jax.random.split(key, 16)
    nrm = lambda k, shape, s: s * jax.random.normal(k, shape, jnp.float32)
    p = {}
    p["conv1_w"] = nrm(ks[0], (4, 1, 1), 0.5);   p["conv1_b"] = nrm(ks[1], (4,), 0.1)
    p["conv2_w"] = nrm(ks[2], (32, 4, 2), 0.3);  p["conv2_b"] = nrm(ks[3], (32,), 0.1)
    p["bn1_g"] = 1.0 + nrm(ks[4], (32,), 0.1);   p["bn1_b"] = nrm(ks[5], (32,), 0.1)
    p["conv3_w"] = nrm(ks[6], (64, 32, 2), 0.15); p["conv3_b"] = nrm(ks[7], (64,), 0.1)
    p["bn2_g"] = 1.0 + nrm(ks[8], (64,), 0.1);   p["bn2_b"] = nrm(ks[9], (64,), 0.1)
    p["lin1_w"] = nrm(ks[10], (50, 192), 0.08);  p["lin1_b"] = nrm(ks[11], (50,), 0.1)
    p["bn3_g"] = 1.0 + nrm(ks[12], (50,), 0.1);  p["bn3_b"] = nrm(ks[13], (50,), 0.1)
    p["lin2_w"] = nrm(ks[14], (1, 50), 0.2);     p["lin2_b"] = nrm(ks[15], (1,), 0.1)
    return p


def to_kernel_params(p):
    """Pack everything into two VMEM slabs (3 input DMAs total, including x)."""
    # --- weight slab: (272, 64), all matmul operands, 8-row-aligned blocks ---
    wm = jnp.zeros((W_ROWS, 64), jnp.float32)
    wm = wm.at[W2A:W2A + 4, 0:32].set(p["conv2_w"][:, :, 0].T)      # (4, 32) tap 0
    wm = wm.at[W2B:W2B + 4, 0:32].set(p["conv2_w"][:, :, 1].T)      # (4, 32) tap 1
    wm = wm.at[W3A:W3A + 32, 0:64].set(p["conv3_w"][:, :, 0].T)     # (32, 64) tap 0
    wm = wm.at[W3B:W3B + 32, 0:64].set(p["conv3_w"][:, :, 1].T)     # (32, 64) tap 1
    # lin1 weight with torch flatten order (feature idx = c*3 + l) folded in:
    vl1 = jnp.transpose(p["lin1_w"].reshape(50, 64, 3), (2, 1, 0))  # (3, 64, 50)
    wm = wm.at[WL1_0:WL1_0 + 64, 0:50].set(vl1[0])
    wm = wm.at[WL1_1:WL1_1 + 64, 0:50].set(vl1[1])
    wm = wm.at[WL1_2:WL1_2 + 64, 0:50].set(vl1[2])

    # --- vector slab: (13, 64), one row per bias/gamma/beta (padded to 64 lanes) ---
    def row(v):
        v = jnp.asarray(v, jnp.float32).reshape(-1)
        return jnp.pad(v, (0, 64 - v.shape[0]))

    vec = jnp.stack([
        row(p["conv1_w"]), row(p["conv1_b"]),
        row(p["conv2_b"]), row(p["bn1_g"]), row(p["bn1_b"]),
        row(p["conv3_b"]), row(p["bn2_g"]), row(p["bn2_b"]),
        row(p["lin1_b"]), row(p["bn3_g"]), row(p["bn3_b"]),
        row(p["lin2_w"]), row(p["lin2_b"]),
    ])
    return wm, vec


# --------------------- pure-JAX reference (mirrors the torch forward) ---------------------
def _conv1d_ref(x, w, b):                  # x (B,Cin,L), w (O,Cin,K)
    K = w.shape[2]; Lout = x.shape[2] - K + 1
    win = jnp.stack([x[:, :, k:k + Lout] for k in range(K)], axis=-1)  # (B,Cin,Lout,K)
    return jnp.einsum('oik,bilk->bol', w, win) + b[None, :, None]


def _bn_train_ref(x, g, b):
    if x.ndim == 3:
        m = jnp.mean(x, axis=(0, 2), keepdims=True)
        v = jnp.mean((x - m) ** 2, axis=(0, 2), keepdims=True)
        return (x - m) / jnp.sqrt(v + EPS) * g[None, :, None] + b[None, :, None]
    m = jnp.mean(x, axis=0, keepdims=True)
    v = jnp.mean((x - m) ** 2, axis=0, keepdims=True)
    return (x - m) / jnp.sqrt(v + EPS) * g[None, :] + b[None, :]


def forward_ref(x, p):
    Bx = x.shape[0]
    xb = x[:, None, :]                                        # (B,1,L)  NCL
    h1 = jax.nn.relu(_conv1d_ref(xb, p["conv1_w"], p["conv1_b"]))
    h2 = _conv1d_ref(h1, p["conv2_w"], p["conv2_b"])          # (B,32,15)
    h2 = h2[:, :, :14].reshape(Bx, 32, 7, 2).max(-1)          # MaxPool1d(2)
    h2 = jax.nn.relu(_bn_train_ref(h2, p["bn1_g"], p["bn1_b"]))
    h3 = _conv1d_ref(h2, p["conv3_w"], p["conv3_b"])          # (B,64,6)
    h3 = h3.reshape(Bx, 64, 3, 2).mean(-1)                    # AvgPool1d(2)
    h3 = jax.nn.relu(_bn_train_ref(h3, p["bn2_g"], p["bn2_b"]))
    h3 = h3.reshape(Bx, 64 * 3)                               # Flatten (torch row-major)
    h4 = h3 @ p["lin1_w"].T + p["lin1_b"]
    h4 = jax.nn.relu(_bn_train_ref(h4, p["bn3_g"], p["bn3_b"]))
    return h4 @ p["lin2_w"].T + p["lin2_b"]


if __name__ == "__main__":
    key = jax.random.PRNGKey(0)
    kx, kp = jax.random.split(key)
    x = jax.random.normal(kx, (B, L), jnp.float32)

    torch_p = init_torch_params(kp)
    wm, vec = to_kernel_params(torch_p)

    out = conv_net_pallas(x, wm, vec)
    out = jax.block_until_ready(out)
    assert out.shape == (B, 1)

    ref = forward_ref(x, torch_p)
    err = float(jnp.max(jnp.abs(out - ref)))
    assert err < 5e-3, f"max abs error {err}"

    # TODO(synk): BatchNorm running-stats update is a training-time side effect and is not
    # reproduced (it does not affect the forward output).
    print("KERNEL_OK")
</pallas_src>

<mosaic_0001>
module attributes {stable_mosaic.version = 11 : i64} {
  func.func @cnn_kernel(%arg0: memref<128x1xf32, #tpu.memory_space<vmem>>, %arg1: memref<272x64xf32, #tpu.memory_space<vmem>>, %arg2: memref<13x64xf32, #tpu.memory_space<vmem>>, %arg3: memref<8x1xf32, #tpu.memory_space<vmem>>) attributes {dimension_semantics = [], scalar_prefetch = 0 : i64, scratch_operands = 0 : i64, tpu.core_type = #tpu.core_type<tc>} {
    %c0 = arith.constant 0 : index
    %c0_0 = arith.constant 0 : index
    %0 = vector.load %arg2[%c0, %c0_0] : memref<13x64xf32, #tpu.memory_space<vmem>>, vector<1x4xf32>
    %c1 = arith.constant 1 : index
    %c0_1 = arith.constant 0 : index
    %1 = vector.load %arg2[%c1, %c0_1] : memref<13x64xf32, #tpu.memory_space<vmem>>, vector<1x4xf32>
    %c0_2 = arith.constant 0 : index
    %c0_3 = arith.constant 0 : index
    %2 = vector.load %arg0[%c0_2, %c0_3] : memref<128x1xf32, #tpu.memory_space<vmem>>, vector<128x1xf32>
    %3 = vector.broadcast %2 : vector<128x1xf32> to vector<128x4xf32>
    %4 = vector.broadcast %0 : vector<1x4xf32> to vector<128x4xf32>
    %5 = arith.mulf %3, %4 : vector<128x4xf32>
    %6 = vector.broadcast %1 : vector<1x4xf32> to vector<128x4xf32>
    %7 = arith.addf %5, %6 : vector<128x4xf32>
    %cst = arith.constant 0.000000e+00 : f32
    %8 = vector.broadcast %cst : f32 to vector<128x4xf32>
    %9 = arith.maximumf %7, %8 : vector<128x4xf32>
    %10 = vector.extract_strided_slice %9 {offsets = [0, 0], sizes = [120, 4], strides = [1, 1]} : vector<128x4xf32> to vector<120x4xf32>
    %c0_4 = arith.constant 0 : index
    %c0_5 = arith.constant 0 : index
    %11 = vector.load %arg1[%c0_4, %c0_5] : memref<272x64xf32, #tpu.memory_space<vmem>>, vector<4x32xf32>
    %cst_6 = arith.constant dense<0.000000e+00> : vector<120x32xf32>
    %12 = tpu.matmul %10, %11, %cst_6 {dimension_numbers = #tpu.dot_dimension_numbers<[1], [0], [0], [1], [0, 0, 1, 1], [], []>} : vector<120x4xf32>, vector<4x32xf32>, vector<120x32xf32> -> vector<120x32xf32>
    %13 = vector.extract_strided_slice %9 {offsets = [8, 0], sizes = [120, 4], strides = [1, 1]} : vector<128x4xf32> to vector<120x4xf32>
    %c8 = arith.constant 8 : index
    %c0_7 = arith.constant 0 : index
    %14 = vector.load %arg1[%c8, %c0_7] : memref<272x64xf32, #tpu.memory_space<vmem>>, vector<4x32xf32>
    %cst_8 = arith.constant dense<0.000000e+00> : vector<120x32xf32>
    %15 = tpu.matmul %13, %14, %cst_8 {dimension_numbers = #tpu.dot_dimension_numbers<[1], [0], [0], [1], [0, 0, 1, 1], [], []>} : vector<120x4xf32>, vector<4x32xf32>, vector<120x32xf32> -> vector<120x32xf32>
    %16 = arith.addf %12, %15 : vector<120x32xf32>
    %c2 = arith.constant 2 : index
    %c0_9 = arith.constant 0 : index
    %17 = vector.load %arg2[%c2, %c0_9] : memref<13x64xf32, #tpu.memory_space<vmem>>, vector<1x32xf32>
    %18 = vector.broadcast %17 : vector<1x32xf32> to vector<120x32xf32>
    %19 = arith.addf %16, %18 : vector<120x32xf32>
    %20 = vector.extract_strided_slice %19 {offsets = [0, 0], sizes = [112, 32], strides = [1, 1]} : vector<120x32xf32> to vector<112x32xf32>
    %21 = vector.shape_cast %20 : vector<112x32xf32> to vector<7x16x32xf32>
    %22 = vector.extract_strided_slice %21 {offsets = [0, 0, 0], sizes = [7, 8, 32], strides = [1, 1, 1]} : vector<7x16x32xf32> to vector<7x8x32xf32>
    %23 = vector.extract_strided_slice %21 {offsets = [0, 8, 0], sizes = [7, 8, 32], strides = [1, 1, 1]} : vector<7x16x32xf32> to vector<7x8x32xf32>
    %24 = arith.maximumf %22, %23 : vector<7x8x32xf32>
    %25 = vector.shape_cast %24 : vector<7x8x32xf32> to vector<56x32xf32>
    %cst_10 = arith.constant dense<0.000000e+00> : vector<32xf32>
    %26 = vector.multi_reduction <add>, %25, %cst_10 [0] : vector<56x32xf32> to vector<32xf32>
    %27 = vector.shape_cast %26 : vector<32xf32> to vector<1x32xf32>
    %cst_11 = arith.constant 0.0178571437 : f32
    %28 = vector.broadcast %cst_11 : f32 to vector<1x32xf32>
    %29 = arith.mulf %27, %28 : vector<1x32xf32>
    %30 = arith.mulf %25, %25 : vector<56x32xf32>
    %cst_12 = arith.constant dense<0.000000e+00> : vector<32xf32>
    %31 = vector.multi_reduction <add>, %30, %cst_12 [0] : vector<56x32xf32> to vector<32xf32>
    %32 = vector.shape_cast %31 : vector<32xf32> to vector<1x32xf32>
    %cst_13 = arith.constant 0.0178571437 : f32
    %33 = vector.broadcast %cst_13 : f32 to vector<1x32xf32>
    %34 = arith.mulf %32, %33 : vector<1x32xf32>
    %35 = arith.mulf %29, %29 : vector<1x32xf32>
    %36 = arith.subf %34, %35 : vector<1x32xf32>
    %cst_14 = arith.constant 9.99999974E-6 : f32
    %37 = vector.broadcast %cst_14 : f32 to vector<1x32xf32>
    %38 = arith.addf %36, %37 : vector<1x32xf32>
    %39 = math.rsqrt %38 : vector<1x32xf32>
    %c3 = arith.constant 3 : index
    %c0_15 = arith.constant 0 : index
    %40 = vector.load %arg2[%c3, %c0_15] : memref<13x64xf32, #tpu.memory_space<vmem>>, vector<1x32xf32>
    %41 = arith.mulf %39, %40 : vector<1x32xf32>
    %42 = vector.broadcast %29 : vector<1x32xf32> to vector<56x32xf32>
    %43 = arith.subf %25, %42 : vector<56x32xf32>
    %44 = vector.broadcast %41 : vector<1x32xf32> to vector<56x32xf32>
    %45 = arith.mulf %43, %44 : vector<56x32xf32>
    %c4 = arith.constant 4 : index
    %c0_16 = arith.constant 0 : index
    %46 = vector.load %arg2[%c4, %c0_16] : memref<13x64xf32, #tpu.memory_space<vmem>>, vector<1x32xf32>
    %47 = vector.broadcast %46 : vector<1x32xf32> to vector<56x32xf32>
    %48 = arith.addf %45, %47 : vector<56x32xf32>
    %cst_17 = arith.constant 0.000000e+00 : f32
    %49 = vector.broadcast %cst_17 : f32 to vector<56x32xf32>
    %50 = arith.maximumf %48, %49 : vector<56x32xf32>
    %51 = vector.extract_strided_slice %50 {offsets = [0, 0], sizes = [48, 32], strides = [1, 1]} : vector<56x32xf32> to vector<48x32xf32>
    %c16 = arith.constant 16 : index
    %c0_18 = arith.constant 0 : index
    %52 = vector.load %arg1[%c16, %c0_18] : memref<272x64xf32, #tpu.memory_space<vmem>>, vector<32x64xf32>
    %cst_19 = arith.constant dense<0.000000e+00> : vector<48x64xf32>
    %53 = tpu.matmul %51, %52, %cst_19 {dimension_numbers = #tpu.dot_dimension_numbers<[1], [0], [0], [1], [0, 0, 1, 1], [], []>} : vector<48x32xf32>, vector<32x64xf32>, vector<48x64xf32> -> vector<48x64xf32>
    %54 = vector.extract_strided_slice %50 {offsets = [8, 0], sizes = [48, 32], strides = [1, 1]} : vector<56x32xf32> to vector<48x32xf32>
    %c48 = arith.constant 48 : index
    %c0_20 = arith.constant 0 : index
    %55 = vector.load %arg1[%c48, %c0_20] : memref<272x64xf32, #tpu.memory_space<vmem>>, vector<32x64xf32>
    %cst_21 = arith.constant dense<0.000000e+00> : vector<48x64xf32>
    %56 = tpu.matmul %54, %55, %cst_21 {dimension_numbers = #tpu.dot_dimension_numbers<[1], [0], [0], [1], [0, 0, 1, 1], [], []>} : vector<48x32xf32>, vector<32x64xf32>, vector<48x64xf32> -> vector<48x64xf32>
    %57 = arith.addf %53, %56 : vector<48x64xf32>
    %c5 = arith.constant 5 : index
    %c0_22 = arith.constant 0 : index
    %58 = vector.load %arg2[%c5, %c0_22] : memref<13x64xf32, #tpu.memory_space<vmem>>, vector<1x64xf32>
    %59 = vector.broadcast %58 : vector<1x64xf32> to vector<48x64xf32>
    %60 = arith.addf %57, %59 : vector<48x64xf32>
    %61 = vector.shape_cast %60 : vector<48x64xf32> to vector<3x16x64xf32>
    %62 = vector.extract_strided_slice %61 {offsets = [0, 0, 0], sizes = [3, 8, 64], strides = [1, 1, 1]} : vector<3x16x64xf32> to vector<3x8x64xf32>
    %63 = vector.extract_strided_slice %61 {offsets = [0, 8, 0], sizes = [3, 8, 64], strides = [1, 1, 1]} : vector<3x16x64xf32> to vector<3x8x64xf32>
    %64 = arith.addf %62, %63 : vector<3x8x64xf32>
    %cst_23 = arith.constant 5.000000e-01 : f32
    %65 = vector.broadcast %cst_23 : f32 to vector<3x8x64xf32>
    %66 = arith.mulf %64, %65 : vector<3x8x64xf32>
    %67 = vector.shape_cast %66 : vector<3x8x64xf32> to vector<24x64xf32>
    %cst_24 = arith.constant dense<0.000000e+00> : vector<64xf32>
    %68 = vector.multi_reduction <add>, %67, %cst_24 [0] : vector<24x64xf32> to vector<64xf32>
    %69 = vector.shape_cast %68 : vector<64xf32> to vector<1x64xf32>
    %cst_25 = arith.constant 0.0416666679 : f32
    %70 = vector.broadcast %cst_25 : f32 to vector<1x64xf32>
    %71 = arith.mulf %69, %70 : vector<1x64xf32>
    %72 = arith.mulf %67, %67 : vector<24x64xf32>
    %cst_26 = arith.constant dense<0.000000e+00> : vector<64xf32>
    %73 = vector.multi_reduction <add>, %72, %cst_26 [0] : vector<24x64xf32> to vector<64xf32>
    %74 = vector.shape_cast %73 : vector<64xf32> to vector<1x64xf32>
    %cst_27 = arith.constant 0.0416666679 : f32
    %75 = vector.broadcast %cst_27 : f32 to vector<1x64xf32>
    %76 = arith.mulf %74, %75 : vector<1x64xf32>
    %77 = arith.mulf %71, %71 : vector<1x64xf32>
    %78 = arith.subf %76, %77 : vector<1x64xf32>
    %cst_28 = arith.constant 9.99999974E-6 : f32
    %79 = vector.broadcast %cst_28 : f32 to vector<1x64xf32>
    %80 = arith.addf %78, %79 : vector<1x64xf32>
    %81 = math.rsqrt %80 : vector<1x64xf32>
    %c6 = arith.constant 6 : index
    %c0_29 = arith.constant 0 : index
    %82 = vector.load %arg2[%c6, %c0_29] : memref<13x64xf32, #tpu.memory_space<vmem>>, vector<1x64xf32>
    %83 = arith.mulf %81, %82 : vector<1x64xf32>
    %84 = vector.broadcast %71 : vector<1x64xf32> to vector<24x64xf32>
    %85 = arith.subf %67, %84 : vector<24x64xf32>
    %86 = vector.broadcast %83 : vector<1x64xf32> to vector<24x64xf32>
    %87 = arith.mulf %85, %86 : vector<24x64xf32>
    %c7 = arith.constant 7 : index
    %c0_30 = arith.constant 0 : index
    %88 = vector.load %arg2[%c7, %c0_30] : memref<13x64xf32, #tpu.memory_space<vmem>>, vector<1x64xf32>
    %89 = vector.broadcast %88 : vector<1x64xf32> to vector<24x64xf32>
    %90 = arith.addf %87, %89 : vector<24x64xf32>
    %cst_31 = arith.constant 0.000000e+00 : f32
    %91 = vector.broadcast %cst_31 : f32 to vector<24x64xf32>
    %92 = arith.maximumf %90, %91 : vector<24x64xf32>
    %93 = vector.extract_strided_slice %92 {offsets = [0, 0], sizes = [8, 64], strides = [1, 1]} : vector<24x64xf32> to vector<8x64xf32>
    %c80 = arith.constant 80 : index
    %c0_32 = arith.constant 0 : index
    %94 = vector.load %arg1[%c80, %c0_32] : memref<272x64xf32, #tpu.memory_space<vmem>>, vector<64x50xf32>
    %cst_33 = arith.constant dense<0.000000e+00> : vector<8x50xf32>
    %95 = tpu.matmul %93, %94, %cst_33 {dimension_numbers = #tpu.dot_dimension_numbers<[1], [0], [0], [1], [0, 0, 1, 1], [], []>} : vector<8x64xf32>, vector<64x50xf32>, vector<8x50xf32> -> vector<8x50xf32>
    %96 = vector.extract_strided_slice %92 {offsets = [8, 0], sizes = [8, 64], strides = [1, 1]} : vector<24x64xf32> to vector<8x64xf32>
    %c144 = arith.constant 144 : index
    %c0_34 = arith.constant 0 : index
    %97 = vector.load %arg1[%c144, %c0_34] : memref<272x64xf32, #tpu.memory_space<vmem>>, vector<64x50xf32>
    %cst_35 = arith.constant dense<0.000000e+00> : vector<8x50xf32>
    %98 = tpu.matmul %96, %97, %cst_35 {dimension_numbers = #tpu.dot_dimension_numbers<[1], [0], [0], [1], [0, 0, 1, 1], [], []>} : vector<8x64xf32>, vector<64x50xf32>, vector<8x50xf32> -> vector<8x50xf32>
    %99 = arith.addf %95, %98 : vector<8x50xf32>
    %100 = vector.extract_strided_slice %92 {offsets = [16, 0], sizes = [8, 64], strides = [1, 1]} : vector<24x64xf32> to vector<8x64xf32>
    %c208 = arith.constant 208 : index
    %c0_36 = arith.constant 0 : index
    %101 = vector.load %arg1[%c208, %c0_36] : memref<272x64xf32, #tpu.memory_space<vmem>>, vector<64x50xf32>
    %cst_37 = arith.constant dense<0.000000e+00> : vector<8x50xf32>
    %102 = tpu.matmul %100, %101, %cst_37 {dimension_numbers = #tpu.dot_dimension_numbers<[1], [0], [0], [1], [0, 0, 1, 1], [], []>} : vector<8x64xf32>, vector<64x50xf32>, vector<8x50xf32> -> vector<8x50xf32>
    %103 = arith.addf %99, %102 : vector<8x50xf32>
    %c8_38 = arith.constant 8 : index
    %c0_39 = arith.constant 0 : index
    %104 = vector.load %arg2[%c8_38, %c0_39] : memref<13x64xf32, #tpu.memory_space<vmem>>, vector<1x50xf32>
    %105 = vector.broadcast %104 : vector<1x50xf32> to vector<8x50xf32>
    %106 = arith.addf %103, %105 : vector<8x50xf32>
    %cst_40 = arith.constant dense<0.000000e+00> : vector<50xf32>
    %107 = vector.multi_reduction <add>, %106, %cst_40 [0] : vector<8x50xf32> to vector<50xf32>
    %108 = vector.shape_cast %107 : vector<50xf32> to vector<1x50xf32>
    %cst_41 = arith.constant 1.250000e-01 : f32
    %109 = vector.broadcast %cst_41 : f32 to vector<1x50xf32>
    %110 = arith.mulf %108, %109 : vector<1x50xf32>
    %111 = arith.mulf %106, %106 : vector<8x50xf32>
    %cst_42 = arith.constant dense<0.000000e+00> : vector<50xf32>
    %112 = vector.multi_reduction <add>, %111, %cst_42 [0] : vector<8x50xf32> to vector<50xf32>
    %113 = vector.shape_cast %112 : vector<50xf32> to vector<1x50xf32>
    %cst_43 = arith.constant 1.250000e-01 : f32
    %114 = vector.broadcast %cst_43 : f32 to vector<1x50xf32>
    %115 = arith.mulf %113, %114 : vector<1x50xf32>
    %116 = arith.mulf %110, %110 : vector<1x50xf32>
    %117 = arith.subf %115, %116 : vector<1x50xf32>
    %cst_44 = arith.constant 9.99999974E-6 : f32
    %118 = vector.broadcast %cst_44 : f32 to vector<1x50xf32>
    %119 = arith.addf %117, %118 : vector<1x50xf32>
    %120 = math.rsqrt %119 : vector<1x50xf32>
    %c9 = arith.constant 9 : index
    %c0_45 = arith.constant 0 : index
    %121 = vector.load %arg2[%c9, %c0_45] : memref<13x64xf32, #tpu.memory_space<vmem>>, vector<1x50xf32>
    %122 = arith.mulf %120, %121 : vector<1x50xf32>
    %123 = vector.broadcast %110 : vector<1x50xf32> to vector<8x50xf32>
    %124 = arith.subf %106, %123 : vector<8x50xf32>
    %125 = vector.broadcast %122 : vector<1x50xf32> to vector<8x50xf32>
    %126 = arith.mulf %124, %125 : vector<8x50xf32>
    %c10 = arith.constant 10 : index
    %c0_46 = arith.constant 0 : index
    %127 = vector.load %arg2[%c10, %c0_46] : memref<13x64xf32, #tpu.memory_space<vmem>>, vector<1x50xf32>
    %128 = vector.broadcast %127 : vector<1x50xf32> to vector<8x50xf32>
    %129 = arith.addf %126, %128 : vector<8x50xf32>
    %cst_47 = arith.constant 0.000000e+00 : f32
    %130 = vector.broadcast %cst_47 : f32 to vector<8x50xf32>
    %131 = arith.maximumf %129, %130 : vector<8x50xf32>
    %c11 = arith.constant 11 : index
    %c0_48 = arith.constant 0 : index
    %132 = vector.load %arg2[%c11, %c0_48] : memref<13x64xf32, #tpu.memory_space<vmem>>, vector<1x50xf32>
    %133 = vector.broadcast %132 : vector<1x50xf32> to vector<8x50xf32>
    %134 = arith.mulf %131, %133 : vector<8x50xf32>
    %cst_49 = arith.constant dense<0.000000e+00> : vector<8xf32>
    %135 = vector.multi_reduction <add>, %134, %cst_49 [1] : vector<8x50xf32> to vector<8xf32>
    %136 = vector.shape_cast %135 : vector<8xf32> to vector<8x1xf32>
    %c12 = arith.constant 12 : index
    %c0_50 = arith.constant 0 : index
    %137 = vector.load %arg2[%c12, %c0_50] : memref<13x64xf32, #tpu.memory_space<vmem>>, vector<1x1xf32>
    %138 = vector.broadcast %137 : vector<1x1xf32> to vector<8x1xf32>
    %139 = arith.addf %136, %138 : vector<8x1xf32>
    %c0_51 = arith.constant 0 : index
    %c0_52 = arith.constant 0 : index
    %140 = vector.load %arg3[%c0_51, %c0_52] : memref<8x1xf32, #tpu.memory_space<vmem>>, vector<8x1xf32>
    tpu.vector_store %arg3[%c0_51, %c0_52], %139 {strides = array<i32>} : memref<8x1xf32, #tpu.memory_space<vmem>>, vector<8x1xf32>,
    return
  }
}

</mosaic_0001>

<bundles_post_ra>
// kernel: conv_net_pallas.1
= control target key start
LH: loop header
LB: loop body
LE: loop exit
PB: predicated region body
PF: predicated region fallthrough
CT: control target
= control target key end

     0   :  { %v1554_v0 = vmov 0   ;;  %v1555_v5 = vmov 0.0   ;;  %vm1556_vm0 = vmmov 0   ;;  %vm216_vm1 = vcmask 1043456   ;;  %s2036_s0 = inlined_call_operand.vmem [shape: f32[128,1], index: 0, kind: input, shape index: {}]   ;;  %s2037_s1 = inlined_call_operand.vmem [shape: f32[272,64], index: 1, kind: input, shape index: {}]   ;;  %s2038_s2 = inlined_call_operand.vmem [shape: f32[13,64], index: 2, kind: input, shape index: {}]   ;;  %s2039_s3 = inlined_call_operand.vmem [shape: f32[8,1], index: 3, kind: output, shape index: {}]  }
   0x1   :  { %1547 = vset.pattern.permute.xlu1 %v1554_v0  ;;  %1546 = vset.pattern.permute.xlu0 %v1554_v0  ;;  %v30_v1 = vld [vmem:[%s2036_s0 + $0x70] sm:$0xff]  ;;  %v16_v2 = vld [vmem:[%s2036_s0] sm:$0xff]  ;;  %v31_v3 = vld [vmem:[%s2036_s0 + $0x78] sm:$0xff]  ;;  %vm170_vm2 = vcmask 31744   ;;  %vm530_vm3 = vcmask 261120   ;;  %vm857_vm4 = vcmask 523264  }
   0x2   :  { %104 = vperm.xlu0 %1546, %v30_v1   ;;  %34 = vperm.xlu1 %1547, %v16_v2   ;;  %v17_v4 = vld [vmem:[%s2036_s0 + $0x8] sm:$0xff]  ;;  %v18_v6 = vld [vmem:[%s2036_s0 + $0x10] sm:$0xff]  ;;  %v19_v7 = vld [vmem:[%s2036_s0 + $0x18] sm:$0xff]  ;;  %vm1162_vm5 = vcmask 408576   ;;  %vm1214_vm6 = vcmask 7168  }
   0x3   :  { %1541 = vmatprep.subr.mxu1 %v1555_v5  ;;  %1397 = vmatprep.mubr.msk.f32.mxu1 %vm1556_vm0, %v1555_v5  ;;  %v169_v8 = vld [vmem:[%s2037_s1 + $0x8] sm:$0xf]  ;;  %v20_v9 = vld [vmem:[%s2036_s0 + $0x20] sm:$0xff]  ;;  %v22_v11 = vld [vmem:[%s2036_s0 + $0x30] sm:$0xff] }
   0x4   :  { %1356 = vmatprep.subr.mxu0 %v1555_v5  ;;  %1358 = vmatprep.mubr.msk.f32.mxu0 %vm1556_vm0, %v1555_v5  ;;  %v21_v10 = vld [vmem:[%s2036_s0 + $0x28] sm:$0xff]  ;;  %v23_v12 = vld [vmem:[%s2036_s0 + $0x38] sm:$0xff]  ;;  %v24_v13 = vld [vmem:[%s2036_s0 + $0x40] sm:$0xff] }
   0x5   :  { %1542 = vmatpush3.msk.msra.mxu1 %vm216_vm1, %v169_v8  ;;  %1357 = vmatpush3.msk.msra.mxu0 %vm216_vm1, %v169_v8  ;;  %v25_v14 = vld [vmem:[%s2036_s0 + $0x48] sm:$0xff]  ;;  %v26_v15 = vld [vmem:[%s2036_s0 + $0x50] sm:$0xff]  ;;  %v27_v16 = vld [vmem:[%s2036_s0 + $0x58] sm:$0xff] }
   0x6   :  { %109 = vperm.xlu0 %1546, %v31_v3   ;;  %39 = vperm.xlu1 %1547, %v17_v4   ;;  %v28_v17 = vld [vmem:[%s2036_s0 + $0x60] sm:$0xff]  ;;  %v29_v18 = vld [vmem:[%s2036_s0 + $0x68] sm:$0xff] }
   0x7   :  { %1403 = vmatprep.subr.mxu1 %v1555_v5  ;;  %v1640_v19 = vld [vmem:[%s2038_s2] ss:$0 sm:$0xff]  ;;  %v1645_v20 = vld [vmem:[%s2038_s2 + $0x1] ss:$0 sm:$0xff] }
   0x8   :  { %v168_v31 = vld [vmem:[%s2037_s1] sm:$0xf] }
   0xa   :  { %44 = vperm.xlu0 %1546, %v18_v6   ;;  %49 = vperm.xlu1 %1547, %v19_v7  }
   0xe   :  { %54 = vperm.xlu0 %1546, %v20_v9   ;;  %59 = vperm.xlu1 %1547, %v21_v10  }
  0x12   :  { %64 = vperm.xlu0 %1546, %v22_v11   ;;  %69 = vperm.xlu1 %1547, %v23_v12  }
  0x16   :  { %74 = vperm.xlu0 %1546, %v24_v13   ;;  %79 = vperm.xlu1 %1547, %v25_v14  }
  0x1a   :  { %84 = vperm.xlu0 %1546, %v26_v15   ;;  %89 = vperm.xlu1 %1547, %v27_v16  }
  0x1e   :  { %94 = vperm.xlu0 %1546, %v28_v17   ;;  %99 = vperm.xlu1 %1547, %v29_v18  }
  0x7d   :  { %v105_v21 = vpop.permute.xlu0 %104  ;;  %v35_v22 = vpop.permute.xlu1 %34 }
  0x7e   :  { %v130_v23 = vmul.f32 %v1640_v19, %v105_v21  ;;  %v116_v25 = vmul.f32 %v1640_v19, %v35_v22 }
  0x80   :  { %v1649_v24 = vadd.f32 %v1645_v20, %v130_v23  ;;  %v136_v32 = vadd.f32 %v1645_v20, %v116_v25  ;;  %v628_v25 = vld [vmem:[%s2037_s1 + $0x48] sm:$0xff] }
  0x81   :  { %v110_v26 = vpop.permute.xlu0 %109  ;;  %v40_v27 = vpop.permute.xlu1 %39  ;;  %1450 = vmatprep.subr.mxu0 %v628_v25 }
  0x82   :  { %v166_v28 = vmax.f32 %v1649_v24, 0.0  ;;  %v131_v29 = vmul.f32 %v1640_v19, %v110_v26  ;;  %v117_v30 = vmul.f32 %v1640_v19, %v40_v27  ;;  %v152_v41 = vmax.f32 %v136_v32, 0.0  ;;  %v623_v26 = vld [vmem:[%s2037_s1 + $0x20] sm:$0xff]  ;;  %v622_v27 = vld [vmem:[%s2037_s1 + $0x18] sm:$0xff] }
  0x83   :  { %v627_v24 = vld [vmem:[%s2037_s1 + $0x40] sm:$0xff] }
  0x84   :  { %v151_v33 = vadd.f32 %v1645_v20, %v131_v29  ;;  %v137_v34 = vadd.f32 %v1645_v20, %v117_v30  ;;  %1398 = vmatmul.mubr.msk.f32.vlgmr.msra.gmra.mxu1 %vm170_vm2, %v166_v28  ;;  %v621_v29 = vld [vmem:[%s2037_s1 + $0x10] sm:$0xff] }
  0x85   :  { %1404 = vmatpush3.msk.msra.mxu1 %vm216_vm1, %v168_v31  ;;  %v45_v35 = vpop.permute.xlu0 %44  ;;  %v50_v36 = vpop.permute.xlu1 %49  ;;  %1400 = vmatprep.mubr.msk.f32.mxu1 %vm1556_vm0, %v1555_v5  ;;  %v625_v30 = vld [vmem:[%s2037_s1 + $0x30] sm:$0xff] }
  0x86   :  { %v167_v37 = vmax.f32 %v151_v33, 0.0  ;;  %v153_v38 = vmax.f32 %v137_v34, 0.0  ;;  %v118_v39 = vmul.f32 %v1640_v19, %v45_v35  ;;  %v119_v40 = vmul.f32 %v1640_v19, %v50_v36 }
  0x88   :  { %v138_v42 = vadd.f32 %v1645_v20, %v118_v39  ;;  %1359 = vmatmul.mubr.msk.f32.vlgmr.msra.gmra.mxu0 %vm170_vm2, %v153_v38  ;;  %1401 = vmatmul.mubr.msk.f32.gmra.mxu1 %vm170_vm2, %v167_v37  ;;  %v139_v45 = vadd.f32 %v1645_v20, %v119_v40 }
  0x89   :  { %v55_v43 = vpop.permute.xlu0 %54  ;;  %1361 = vmatprep.mubr.msk.f32.mxu0 %vm1556_vm0, %v1555_v5  ;;  %1405 = vmatprep.mubr.msk.f32.mxu1 %vm1556_vm0, %v1555_v5  ;;  %v60_v47 = vpop.permute.xlu1 %59 }
  0x8a   :  { %v154_v44 = vmax.f32 %v138_v42, 0.0  ;;  %v120_v46 = vmul.f32 %v1640_v19, %v55_v43  ;;  %v155_v48 = vmax.f32 %v139_v45, 0.0  ;;  %v121_v50 = vmul.f32 %v1640_v19, %v60_v47  ;;  %1451 = vmatpush3.msra.mxu0 %v628_v25 }
  0x8b   :  { %1452 = vmatprep.subr.mxu0 %v627_v24 }
  0x8c   :  { %1362 = vmatmul.mubr.msk.f32.gmra.mxu0 %vm170_vm2, %v154_v44  ;;  %1406 = vmatmul.mubr.msk.f32.vlgmr.msra.gmra.mxu1 %vm170_vm2, %v152_v41  ;;  %v140_v49 = vadd.f32 %v1645_v20, %v120_v46  ;;  %v141_v53 = vadd.f32 %v1645_v20, %v121_v50 }
  0x8d   :  { %1364 = vmatprep.mubr.msk.f32.mxu0 %vm1556_vm0, %v1555_v5  ;;  %1408 = vmatprep.mubr.msk.f32.mxu1 %vm1556_vm0, %v1555_v5  ;;  %v65_v51 = vpop.permute.xlu0 %64  ;;  %v70_v55 = vpop.permute.xlu1 %69 }
  0x8e   :  { %v156_v52 = vmax.f32 %v140_v49, 0.0  ;;  %v122_v54 = vmul.f32 %v1640_v19, %v65_v51  ;;  %v157_v56 = vmax.f32 %v141_v53, 0.0  ;;  %v123_v58 = vmul.f32 %v1640_v19, %v70_v55  ;;  %1453 = vmatpush3.msra.mxu0 %v627_v24 }
  0x90   :  { %1365 = vmatmul.mubr.msk.f32.gmra.mxu0 %vm170_vm2, %v155_v48  ;;  %1409 = vmatmul.mubr.msk.f32.gmra.mxu1 %vm170_vm2, %v153_v38  ;;  %v142_v57 = vadd.f32 %v1645_v20, %v122_v54  ;;  %v143_v61 = vadd.f32 %v1645_v20, %v123_v58 }
  0x91   :  { %1367 = vmatprep.mubr.msk.f32.mxu0 %vm1556_vm0, %v1555_v5  ;;  %1411 = vmatprep.mubr.msk.f32.mxu1 %vm1556_vm0, %v1555_v5  ;;  %v75_v59 = vpop.permute.xlu0 %74  ;;  %v80_v63 = vpop.permute.xlu1 %79 }
  0x92   :  { %v158_v60 = vmax.f32 %v142_v57, 0.0  ;;  %v124_v62 = vmul.f32 %v1640_v19, %v75_v59  ;;  %v159_v0 = vmax.f32 %v143_v61, 0.0  ;;  %v125_v2 = vmul.f32 %v1640_v19, %v80_v63 }
  0x94   :  { %1368 = vmatmul.mubr.msk.f32.gmra.mxu0 %vm170_vm2, %v156_v52  ;;  %1412 = vmatmul.mubr.msk.f32.gmra.mxu1 %vm170_vm2, %v154_v44  ;;  %v144_v1 = vadd.f32 %v1645_v20, %v124_v62  ;;  %v145_v6 = vadd.f32 %v1645_v20, %v125_v2 }
  0x95   :  { %1370 = vmatprep.mubr.msk.f32.mxu0 %vm1556_vm0, %v1555_v5  ;;  %1414 = vmatprep.mubr.msk.f32.mxu1 %vm1556_vm0, %v1555_v5  ;;  %v85_v3 = vpop.permute.xlu0 %84  ;;  %v90_v8 = vpop.permute.xlu1 %89 }
  0x96   :  { %v160_v4 = vmax.f32 %v144_v1, 0.0  ;;  %v126_v7 = vmul.f32 %v1640_v19, %v85_v3  ;;  %v161_v9 = vmax.f32 %v145_v6, 0.0  ;;  %v127_v11 = vmul.f32 %v1640_v19, %v90_v8 }
  0x98   :  { %1371 = vmatmul.mubr.msk.f32.gmra.mxu0 %vm170_vm2, %v157_v56  ;;  %1415 = vmatmul.mubr.msk.f32.gmra.mxu1 %vm170_vm2, %v155_v48  ;;  %v146_v10 = vadd.f32 %v1645_v20, %v126_v7  ;;  %v147_v14 = vadd.f32 %v1645_v20, %v127_v11 }
  0x99   :  { %1373 = vmatprep.mubr.msk.f32.mxu0 %vm1556_vm0, %v1555_v5  ;;  %1417 = vmatprep.mubr.msk.f32.mxu1 %vm1556_vm0, %v1555_v5  ;;  %v95_v12 = vpop.permute.xlu0 %94  ;;  %v100_v16 = vpop.permute.xlu1 %99 }
  0x9a   :  { %v162_v13 = vmax.f32 %v146_v10, 0.0  ;;  %v128_v15 = vmul.f32 %v1640_v19, %v95_v12  ;;  %v163_v17 = vmax.f32 %v147_v14, 0.0  ;;  %v129_v21 = vmul.f32 %v1640_v19, %v100_v16 }
  0x9c   :  { %1374 = vmatmul.mubr.msk.f32.gmra.mxu0 %vm170_vm2, %v158_v60  ;;  %1418 = vmatmul.mubr.msk.f32.gmra.mxu1 %vm170_vm2, %v156_v52  ;;  %v148_v18 = vadd.f32 %v1645_v20, %v128_v15  ;;  %v149_v23 = vadd.f32 %v1645_v20, %v129_v21  ;;  %v624_v20 = vld [vmem:[%s2037_s1 + $0x28] sm:$0xff]  ;;  %v1807_v15 = vld [vmem:[%s2038_s2 + $0x2] ss:$0 sm:$0xff] }
  0x9d   :  { %1376 = vmatprep.mubr.msk.f32.mxu0 %vm1556_vm0, %v1555_v5  ;;  %1420 = vmatprep.mubr.msk.f32.mxu1 %vm1556_vm0, %v1555_v5 }
  0x9e   :  { %v164_v22 = vmax.f32 %v148_v18, 0.0  ;;  %v165_v19 = vmax.f32 %v149_v23, 0.0  ;;  %1467 = vmatprep.subr.mxu1 %v624_v20 }
  0x9f   :  { %1468 = vmatpush3.msra.mxu1 %v624_v20 }
  0xa0   :  { %1377 = vmatmul.mubr.msk.f32.gmra.mxu0 %vm170_vm2, %v159_v0  ;;  %1421 = vmatmul.mubr.msk.f32.gmra.mxu1 %vm170_vm2, %v157_v56 }
  0xa1   :  { %1379 = vmatprep.mubr.msk.f32.mxu0 %vm1556_vm0, %v1555_v5  ;;  %1423 = vmatprep.mubr.msk.f32.mxu1 %vm1556_vm0, %v1555_v5 }
  0xa2   :  { %1469 = vmatprep.subr.mxu1 %v623_v26 }
  0xa3   :  { %1470 = vmatpush3.msra.mxu1 %v623_v26 }
  0xa4   :  { %1380 = vmatmul.mubr.msk.f32.gmra.mxu0 %vm170_vm2, %v160_v4  ;;  %1424 = vmatmul.mubr.msk.f32.gmra.mxu1 %vm170_vm2, %v158_v60 }
  0xa5   :  { %1382 = vmatprep.mubr.msk.f32.mxu0 %vm1556_vm0, %v1555_v5  ;;  %1426 = vmatprep.mubr.msk.f32.mxu1 %vm1556_vm0, %v1555_v5 }
  0xa6   :  { %1471 = vmatprep.subr.mxu1 %v622_v27 }
  0xa7   :  { %1472 = vmatpush3.msra.mxu1 %v622_v27 }
  0xa8   :  { %1383 = vmatmul.mubr.msk.f32.gmra.mxu0 %vm170_vm2, %v161_v9  ;;  %1427 = vmatmul.mubr.msk.f32.gmra.mxu1 %vm170_vm2, %v159_v0 }
  0xa9   :  { %1385 = vmatprep.mubr.msk.f32.mxu0 %vm1556_vm0, %v1555_v5  ;;  %1429 = vmatprep.mubr.msk.f32.mxu1 %vm1556_vm0, %v1555_v5 }
  0xaa   :  { %1473 = vmatprep.subr.mxu1 %v621_v29 }
  0xab   :  { %1474 = vmatpush3.msra.mxu1 %v621_v29 }
  0xac   :  { %1386 = vmatmul.mubr.msk.f32.gmra.mxu0 %vm170_vm2, %v162_v13  ;;  %1430 = vmatmul.mubr.msk.f32.gmra.mxu1 %vm170_vm2, %v160_v4 }
  0xad   :  { %1388 = vmatprep.mubr.msk.f32.mxu0 %vm1556_vm0, %v1555_v5  ;;  %1432 = vmatprep.mubr.msk.f32.mxu1 %vm1556_vm0, %v1555_v5 }
  0xae   :  { %1503 = vmatprep.subr.mxu1 %v1555_v5 }
  0xb0   :  { %1389 = vmatmul.mubr.msk.f32.gmra.mxu0 %vm170_vm2, %v163_v17  ;;  %1433 = vmatmul.mubr.msk.f32.gmra.mxu1 %vm170_vm2, %v161_v9 }
  0xb1   :  { %1391 = vmatprep.mubr.msk.f32.mxu0 %vm1556_vm0, %v1555_v5  ;;  %1435 = vmatprep.mubr.msk.f32.mxu1 %vm1556_vm0, %v1555_v5 }
  0xb4   :  { %1392 = vmatmul.mubr.msk.f32.gmra.mxu0 %vm170_vm2, %v164_v22  ;;  %1436 = vmatmul.mubr.msk.f32.gmra.mxu1 %vm170_vm2, %v162_v13 }
  0xb5   :  { %1394 = vmatprep.mubr.msk.f32.mxu0 %vm1556_vm0, %v1555_v5  ;;  %1438 = vmatprep.mubr.msk.f32.mxu1 %vm1556_vm0, %v1555_v5 }
  0xb8   :  { %1395 = vmatmul.mubr.msk.f32.gmra.mxu0 %vm170_vm2, %v165_v19  ;;  %1439 = vmatmul.mubr.msk.f32.gmra.mxu1 %vm170_vm2, %v163_v17 }
  0xb9   :  { %1441 = vmatprep.mubr.msk.f32.mxu1 %vm1556_vm0, %v1555_v5 }
  0xbc   :  { %1442 = vmatmul.mubr.msk.f32.gmra.mxu1 %vm170_vm2, %v164_v22 }
  0xbd   :  { %1444 = vmatprep.mubr.msk.f32.mxu1 %vm1556_vm0, %v1555_v5 }
  0xc0   :  { %1445 = vmatmul.mubr.msk.f32.gmra.mxu1 %vm170_vm2, %v165_v19 }
  0xc1   :  { %1447 = vmatprep.mubr.msk.f32.mxu1 %vm1556_vm0, %v1555_v5 }
  0xc4   :  { %1448 = vmatmul.mubr.msk.f32.gmra.mxu1 %vm170_vm2, %v166_v28  ;;  %v626_v28 = vld [vmem:[%s2037_s1 + $0x38] sm:$0xff] }
  0xc5   :  { %1454 = vmatprep.subr.mxu0 %v626_v28 }
  0xc6   :  { %1455 = vmatpush3.msra.mxu0 %v626_v28 }
  0xc7   :  { %1456 = vmatprep.subr.mxu0 %v625_v30 }
  0xc8   :  { %1457 = vmatpush3.msra.mxu0 %v625_v30 }
  0xc9   :  { %1484 = vmatprep.subr.mxu0 %v1555_v5 }
 0x144   :  { %v1802_v31 = vpop.f32.mrf.mxu1 }
 0x146   :  { %v1399_v32 = vpop.f32.mrf.mxu1 }
 0x148   :  { %v286_v33 = vpop.f32.mrf.mxu0  ;;  %v356_v34 = vpop.f32.mrf.mxu1 }
 0x14a   :  { %v1360_v35 = vpop.f32.mrf.mxu0  ;;  %v1402_v36 = vpop.f32.mrf.mxu1 }
 0x14c   :  { %v291_v37 = vpop.f32.mrf.mxu0  ;;  %v431_v38 = vpop.f32.mrf.mxu1 }
 0x14d   :  { %v432_v14 = vadd.f32 %v431_v38, %v286_v33 }
 0x14e   :  { %v1363_v39 = vpop.f32.mrf.mxu0  ;;  %v1407_v40 = vpop.f32.mrf.mxu1 }
 0x14f   :  { %v509_v28 = vadd.f32 %v1807_v15, %v432_v14 }
 0x150   :  { %v296_v41 = vpop.f32.mrf.mxu0  ;;  %v436_v42 = vpop.f32.mrf.mxu1 }
 0x151   :  { %v437_v9 = vadd.f32 %v436_v42, %v291_v37 }
 0x152   :  { %v1366_v43 = vpop.f32.mrf.mxu0  ;;  %v1410_v44 = vpop.f32.mrf.mxu1 }
 0x153   :  { %v510_v23 = vadd.f32 %v1807_v15, %v437_v9 }
 0x154   :  { %v301_v45 = vpop.f32.mrf.mxu0  ;;  %v441_v46 = vpop.f32.mrf.mxu1 }
 0x155   :  { %v442_v12 = vadd.f32 %v441_v46, %v296_v41  ;;  %v1818_v36 = vmax.f32 %v509_v28, %v510_v23 }
 0x156   :  { %v1369_v47 = vpop.f32.mrf.mxu0  ;;  %v1413_v48 = vpop.f32.mrf.mxu1 }
 0x157   :  { %v511_v25 = vadd.f32 %v1807_v15, %v442_v12 }
 0x158   :  { %v306_v49 = vpop.f32.mrf.mxu0  ;;  %v446_v50 = vpop.f32.mrf.mxu1 }
 0x159   :  { %v447_v8 = vadd.f32 %v446_v50, %v301_v45 }
 0x15a   :  { %v1372_v51 = vpop.f32.mrf.mxu0  ;;  %v1416_v52 = vpop.f32.mrf.mxu1 }
 0x15b   :  { %v512_v18 = vadd.f32 %v1807_v15, %v447_v8 }
 0x15c   :  { %v311_v53 = vpop.f32.mrf.mxu0  ;;  %v451_v54 = vpop.f32.mrf.mxu1 }
 0x15d   :  { %v452_v21 = vadd.f32 %v451_v54, %v306_v49  ;;  %v1814_v32 = vmax.f32 %v511_v25, %v512_v18  ;;  %v551_v49 = vmul.f32 %v1818_v36, %v1818_v36 }
 0x15e   :  { %v1375_v55 = vpop.f32.mrf.mxu0  ;;  %v1419_v56 = vpop.f32.mrf.mxu1 }
 0x15f   :  { %v513_v33 = vadd.f32 %v1807_v15, %v452_v21  ;;  %v552_v45 = vmul.f32 %v1814_v32, %v1814_v32  ;;  %v532_v50 = vsel %vm530_vm3, %v1814_v32, 0.0 }
 0x160   :  { %v316_v57 = vpop.f32.mrf.mxu0  ;;  %v456_v58 = vpop.f32.mrf.mxu1 }
 0x161   :  { %v457_v13 = vadd.f32 %v456_v58, %v311_v53 }
 0x162   :  { %v1378_v59 = vpop.f32.mrf.mxu0  ;;  %v1422_v60 = vpop.f32.mrf.mxu1 }
 0x163   :  { %v514_v26 = vadd.f32 %v1807_v15, %v457_v13  ;;  %v559_v59 = vsel %vm530_vm3, %v552_v45, 0.0 }
 0x164   :  { %v321_v61 = vpop.f32.mrf.mxu0  ;;  %v461_v62 = vpop.f32.mrf.mxu1 }
 0x165   :  { %v462_v24 = vadd.f32 %v461_v62, %v316_v57  ;;  %v1820_v39 = vmax.f32 %v513_v33, %v514_v26  ;;  %v531_v57 = vsel %vm530_vm3, %v1818_v36, 0.0 }
 0x166   :  { %v1381_v63 = vpop.f32.mrf.mxu0  ;;  %v1425_v0 = vpop.f32.mrf.mxu1 }
 0x167   :  { %v515_v40 = vadd.f32 %v1807_v15, %v462_v24  ;;  %v553_v53 = vmul.f32 %v1820_v39, %v1820_v39  ;;  %v534_v60 = vsel %vm530_vm3, %v1820_v39, 0.0  ;;  %v558_v63 = vsel %vm530_vm3, %v551_v49, 0.0 }
 0x168   :  { %v326_v1 = vpop.f32.mrf.mxu0  ;;  %v466_v2 = vpop.f32.mrf.mxu1  ;;  %v533_v0 = vadd.f32 %v532_v50, %v531_v57  ;;  %v591_v57 = vlaneseq }
 0x169   :  { %v467_v22 = vadd.f32 %v466_v2, %v321_v61  ;;  %v561_v2 = vsel %vm530_vm3, %v553_v53, 0.0 }
 0x16a   :  { %v1384_v3 = vpop.f32.mrf.mxu0  ;;  %v1428_v4 = vpop.f32.mrf.mxu1  ;;  %v535_v8 = vadd.f32 %v534_v60, %v533_v0 }
 0x16b   :  { %v516_v34 = vadd.f32 %v1807_v15, %v467_v22 }
 0x16c   :  { %v331_v6 = vpop.f32.mrf.mxu0  ;;  %v471_v7 = vpop.f32.mrf.mxu1 }
 0x16d   :  { %v472_v35 = vadd.f32 %v471_v7, %v326_v1  ;;  %v1826_v46 = vmax.f32 %v515_v40, %v516_v34  ;;  %v560_v7 = vadd.f32 %v559_v59, %v558_v63  ;;  %v582_v59 = vld [vmem:[%s2038_s2 + $0x3] sm:$0x1] }
 0x16e   :  { %v1387_v10 = vpop.f32.mrf.mxu0  ;;  %v1431_v11 = vpop.f32.mrf.mxu1 }
 0x16f   :  { %v517_v47 = vadd.f32 %v1807_v15, %v472_v35  ;;  %v554_v61 = vmul.f32 %v1826_v46, %v1826_v46  ;;  %v536_v3 = vsel %vm530_vm3, %v1826_v46, 0.0  ;;  %v562_v14 = vadd.f32 %v561_v2, %v560_v7 }
 0x170   :  { %v336_v16 = vpop.f32.mrf.mxu0  ;;  %v476_v17 = vpop.f32.mrf.mxu1 }
 0x171   :  { %v477_v27 = vadd.f32 %v476_v17, %v331_v6  ;;  %v563_v10 = vsel %vm530_vm3, %v554_v61, 0.0 }
 0x172   :  { %v1390_v19 = vpop.f32.mrf.mxu0  ;;  %v1434_v20 = vpop.f32.mrf.mxu1 }
 0x173   :  { %v518_v41 = vadd.f32 %v1807_v15, %v477_v27  ;;  %v564_v19 = vadd.f32 %v563_v10, %v562_v14 }
 0x174   :  { %v341_v29 = vpop.f32.mrf.mxu0  ;;  %v481_v30 = vpop.f32.mrf.mxu1 }
 0x175   :  { %v482_v42 = vadd.f32 %v481_v30, %v336_v16  ;;  %v1835_v54 = vmax.f32 %v517_v47, %v518_v41  ;;  %v537_v16 = vadd.f32 %v536_v3, %v535_v8 }
 0x176   :  { %v1393_v37 = vpop.f32.mrf.mxu0  ;;  %v1437_v38 = vpop.f32.mrf.mxu1 }
 0x177   :  { %v519_v55 = vadd.f32 %v1807_v15, %v482_v42  ;;  %v555_v4 = vmul.f32 %v1835_v54, %v1835_v54  ;;  %v538_v11 = vsel %vm530_vm3, %v1835_v54, 0.0 }
 0x178   :  { %v346_v43 = vpop.f32.mrf.mxu0  ;;  %v486_v44 = vpop.f32.mrf.mxu1  ;;  %v539_v20 = vadd.f32 %v538_v11, %v537_v16 }
 0x179   :  { %v487_v48 = vadd.f32 %v486_v44, %v341_v29  ;;  %v565_v18 = vsel %vm530_vm3, %v555_v4, 0.0 }
 0x17a   :  { %v1396_v51 = vpop.f32.mrf.mxu0  ;;  %v1440_v52 = vpop.f32.mrf.mxu1  ;;  %v566_v27 = vadd.f32 %v565_v18, %v564_v19 }
 0x17b   :  { %v520_v56 = vadd.f32 %v1807_v15, %v487_v48 }
 0x17c   :  { %v491_v58 = vpop.f32.mrf.mxu1 }
 0x17d   :  { %v1846_v62 = vmax.f32 %v519_v55, %v520_v56  ;;  %v492_v6 = vadd.f32 %v491_v58, %v346_v43  ;;  %v592_v58 = vshrl.u32 %v591_v57, 7 }
 0x17e   :  { %v1443_v1 = vpop.f32.mrf.mxu1 }
 0x17f   :  { %v556_v12 = vmul.f32 %v1846_v62, %v1846_v62  ;;  %v540_v21 = vsel %vm530_vm3, %v1846_v62, 0.0  ;;  %v521_v22 = vadd.f32 %v1807_v15, %v492_v6  ;;  %v1871_v60 = vsub.s32 0, %v592_v58  ;;  %v1255_v6 = vld [vmem:[%s2038_s2 + $0x4] ss:$0 sm:$0xff] }
 0x180   :  { %v496_v9 = vpop.f32.mrf.mxu1 }
 0x181   :  { %v497_v13 = vadd.f32 %v496_v9, %v1802_v31  ;;  %v567_v26 = vsel %vm530_vm3, %v556_v12, 0.0  ;;  %v541_v31 = vadd.f32 %v540_v21, %v539_v20 }
 0x182   :  { %v1446_v17 = vpop.f32.mrf.mxu1  ;;  %v568_v33 = vadd.f32 %v567_v26, %v566_v27  ;;  %v919_v27 = vld [vmem:[%s2037_s1 + $0x88] sm:$0xff] }
 0x183   :  { %v522_v23 = vadd.f32 %v1807_v15, %v497_v13 }
 0x184   :  { %v501_v25 = vpop.f32.mrf.mxu1 }
 0x185   :  { %v529_v24 = vmax.f32 %v521_v22, %v522_v23 }
 0x186   :  { %v1449_v28 = vpop.f32.mrf.mxu1 }
 0x187   :  { %v542_v29 = vsel %vm530_vm3, %v529_v24, 0.0  ;;  %v557_v30 = vmul.f32 %v529_v24, %v529_v24  ;;  %v918_v28 = vld [vmem:[%s2037_s1 + $0x80] sm:$0xff] }
 0x188   :  { %v543_v34 = vadd.f32 %v542_v29, %v541_v31  ;;  %v926_v31 = vld [vmem:[%s2037_s1 + $0xc0] sm:$0xff]  ;;  %v925_v29 = vld [vmem:[%s2037_s1 + $0xb8] sm:$0xff] }
 0x189   :  { %v569_v35 = vsel %vm530_vm3, %v557_v30, 0.0  ;;  %v917_v30 = vld [vmem:[%s2037_s1 + $0x78] sm:$0xff] }
 0x18a   :  { %v544_v37 = vrot.slane %v543_v34, 4  ;;  %v570_v38 = vadd.f32 %v569_v35, %v568_v33  ;;  %v924_v33 = vld [vmem:[%s2037_s1 + $0xb0] sm:$0xff]  ;;  %v923_v35 = vld [vmem:[%s2037_s1 + $0xa8] sm:$0xff] }
 0x18c   :  { %v545_v40 = vadd.f32 %v544_v37, %v543_v34  ;;  %v571_v15 = vrot.slane %v570_v38, 4  ;;  %v916_v34 = vld [vmem:[%s2037_s1 + $0x70] sm:$0xff]  ;;  %v915_v37 = vld [vmem:[%s2037_s1 + $0x68] sm:$0xff] }
 0x18e   :  { %v546_v41 = vrot.slane %v545_v40, 2  ;;  %v572_v42 = vadd.f32 %v571_v15, %v570_v38  ;;  %v922_v38 = vld [vmem:[%s2037_s1 + $0xa0] sm:$0xff]  ;;  %v921_v15 = vld [vmem:[%s2037_s1 + $0x98] sm:$0xff] }
 0x190   :  { %v547_v43 = vadd.f32 %v546_v41, %v545_v40  ;;  %v573_v44 = vrot.slane %v572_v42, 2  ;;  %v914_v40 = vld [vmem:[%s2037_s1 + $0x60] sm:$0xff]  ;;  %v913_v41 = vld [vmem:[%s2037_s1 + $0x58] sm:$0xff] }
 0x192   :  { %v548_v45 = vrot.slane %v547_v43, 1  ;;  %v574_v47 = vadd.f32 %v573_v44, %v572_v42  ;;  %v920_v42 = vld [vmem:[%s2037_s1 + $0x90] sm:$0xff] }
 0x194   :  { %v549_v48 = vadd.f32 %v548_v45, %v547_v43  ;;  %v575_v49 = vrot.slane %v574_v47, 1  ;;  %v912_v43 = vld [vmem:[%s2037_s1 + $0x50] sm:$0xff] }
 0x196   :  { %v550_v50 = vmul.f32 0.017857144, %v549_v48  ;;  %v576_v51 = vadd.f32 %v575_v49, %v574_v47 }
 0x198   :  { %v577_v52 = vmul.f32 0.017857144, %v576_v51  ;;  %v578_v53 = vmul.f32 %v550_v50, %v550_v50  ;;  %v585_v0 = vsub.f32 %v1814_v32, %v550_v50  ;;  %v584_v2 = vsub.f32 %v1818_v36, %v550_v50 }
 0x199   :  { %v586_v3 = vsub.f32 %v1820_v39, %v550_v50  ;;  %v587_v4 = vsub.f32 %v1826_v46, %v550_v50  ;;  %v588_v7 = vsub.f32 %v1835_v54, %v550_v50  ;;  %v589_v8 = vsub.f32 %v1846_v62, %v550_v50 }
 0x19a   :  { %v579_v55 = vsub.f32 %v577_v52, %v578_v53  ;;  %v590_v17 = vsub.f32 %v529_v24, %v550_v50  ;;  %v927_v24 = vld [vmem:[%s2037_s1 + $0xc8] sm:$0xff]  ;;  %v1268_v50 = vld [vmem:[%s2038_s2 + $0x5] ss:$0 sm:$0xff] }
 0x19c   :  { %v580_v56 = vadd.f32 1e-05, %v579_v55 }
 0x19e   :  { %1548 = vrsqrt.f32 %v580_v56 }
 0x1ab   :  { %v1549_v61 = vpop.eup %1548 }
 0x1ac   :  { %v583_v63 = vmul.f32 %v1549_v61, %v582_v59 }
 0x1ae   :  { %v594_v1 = vrot.slane %v583_v63, %v1871_v60 }
 0x1b0   :  { %v596_v9 = vmul.f32 %v594_v1, %v585_v0  ;;  %v595_v10 = vmul.f32 %v594_v1, %v584_v2  ;;  %v597_v11 = vmul.f32 %v594_v1, %v586_v3  ;;  %v598_v32 = vmul.f32 %v594_v1, %v587_v4 }
 0x1b1   :  { %v599_v12 = vmul.f32 %v594_v1, %v588_v7  ;;  %v600_v13 = vmul.f32 %v594_v1, %v589_v8  ;;  %v601_v23 = vmul.f32 %v594_v1, %v590_v17 }
 0x1b2   :  { %v608_v14 = vadd.f32 %v1255_v6, %v596_v9  ;;  %v607_v36 = vadd.f32 %v1255_v6, %v595_v10  ;;  %v609_v16 = vadd.f32 %v1255_v6, %v597_v11  ;;  %v610_v39 = vadd.f32 %v1255_v6, %v598_v32 }
 0x1b3   :  { %v611_v22 = vadd.f32 %v1255_v6, %v599_v12  ;;  %v612_v62 = vadd.f32 %v1255_v6, %v600_v13  ;;  %v613_v20 = vadd.f32 %v1255_v6, %v601_v23 }
 0x1b4   :  { %v615_v46 = vmax.f32 %v608_v14, 0.0  ;;  %v614_v18 = vmax.f32 %v607_v36, 0.0  ;;  %v616_v21 = vmax.f32 %v609_v16, 0.0  ;;  %v617_v54 = vmax.f32 %v610_v39, 0.0 }
 0x1b5   :  { %v618_v19 = vmax.f32 %v611_v22, 0.0  ;;  %v619_v25 = vmax.f32 %v612_v62, 0.0  ;;  %v620_v26 = vmax.f32 %v613_v20, 0.0 }
 0x1b6   :  { %1458 = vmatprep.mubr.msk.f32.mxu0 %vm530_vm3, %v615_v46  ;;  %1475 = vmatprep.mubr.msk.f32.mxu1 %vm530_vm3, %v614_v18 }
 0x1b7   :  { %1459 = vmatmul.mubr.msk.f32.vlgmr.msra.gmra.mxu0 %vm530_vm3, %v616_v21  ;;  %1476 = vmatmul.mubr.msk.f32.vlgmr.msra.gmra.mxu1 %vm530_vm3, %v615_v46 }
 0x1b8   :  { %1461 = vmatprep.mubr.msk.f32.mxu0 %vm530_vm3, %v617_v54  ;;  %1478 = vmatprep.mubr.msk.f32.mxu1 %vm530_vm3, %v616_v21 }
 0x1b9   :  { %1485 = vmatpush3.msra.mxu0 %v927_v24  ;;  %1504 = vmatpush3.msra.mxu1 %v919_v27 }
 0x1ba   :  { %1486 = vmatprep.subr.mxu0 %v1555_v5  ;;  %1505 = vmatprep.subr.mxu1 %v1555_v5 }
 0x1bb   :  { %1462 = vmatmul.mubr.msk.f32.gmra.mxu0 %vm530_vm3, %v618_v19  ;;  %1479 = vmatmul.mubr.msk.f32.gmra.mxu1 %vm530_vm3, %v617_v54 }
 0x1bc   :  { %1464 = vmatprep.mubr.msk.f32.mxu0 %vm530_vm3, %v619_v25  ;;  %1481 = vmatprep.mubr.msk.f32.mxu1 %vm530_vm3, %v618_v19 }
 0x1bd   :  { %1487 = vmatpush3.msra.mxu0 %v926_v31  ;;  %1506 = vmatpush3.msra.mxu1 %v918_v28 }
 0x1be   :  { %1488 = vmatprep.subr.mxu0 %v1555_v5  ;;  %1507 = vmatprep.subr.mxu1 %v1555_v5 }
 0x1bf   :  { %1465 = vmatmul.mubr.msk.f32.gmra.mxu0 %vm530_vm3, %v620_v26  ;;  %1482 = vmatmul.mubr.msk.f32.gmra.mxu1 %vm530_vm3, %v619_v25 }
 0x1c0   :  { %1500 = vmatprep.mubr.msk.f32.mxu0 %vm1556_vm0, %v1555_v5  ;;  %1519 = vmatprep.mubr.msk.f32.mxu1 %vm1556_vm0, %v1555_v5 }
 0x1c1   :  { %1489 = vmatpush3.msra.mxu0 %v925_v29  ;;  %1508 = vmatpush3.msra.mxu1 %v917_v30 }
 0x1c2   :  { %1490 = vmatprep.subr.mxu0 %v1555_v5  ;;  %1509 = vmatprep.subr.mxu1 %v1555_v5 }
 0x1c3   :  { %1491 = vmatpush3.msra.mxu0 %v924_v33  ;;  %1510 = vmatpush3.msra.mxu1 %v916_v34 }
 0x1c4   :  { %1492 = vmatprep.subr.mxu0 %v1555_v5  ;;  %1511 = vmatprep.subr.mxu1 %v1555_v5 }
 0x1c5   :  { %1493 = vmatpush3.msra.mxu0 %v923_v35  ;;  %1512 = vmatpush3.msra.mxu1 %v915_v37 }
 0x1c6   :  { %1494 = vmatprep.subr.mxu0 %v1555_v5  ;;  %1513 = vmatprep.subr.mxu1 %v1555_v5 }
 0x1c7   :  { %1495 = vmatpush3.msra.mxu0 %v922_v38  ;;  %1514 = vmatpush3.msra.mxu1 %v914_v40 }
 0x1c8   :  { %1496 = vmatprep.subr.mxu0 %v1555_v5  ;;  %1515 = vmatprep.subr.mxu1 %v1555_v5 }
 0x1c9   :  { %1497 = vmatpush3.msra.mxu0 %v921_v15  ;;  %1516 = vmatpush3.msra.mxu1 %v913_v41 }
 0x1ca   :  { %1498 = vmatprep.subr.mxu0 %v1555_v5  ;;  %1517 = vmatprep.subr.mxu1 %v1555_v5 }
 0x1cb   :  { %1499 = vmatpush3.msra.mxu0 %v920_v42  ;;  %1518 = vmatpush3.msra.mxu1 %v912_v43  ;;  %v889_v43 = vld [vmem:[%s2038_s2 + $0x6] sm:$0x1] }
 0x1cc   :  { %1522 = vmatprep.subr.mxu0 %v1555_v5 }
 0x277   :  { %v1460_v44 = vpop.f32.mrf.mxu0  ;;  %v1477_v45 = vpop.f32.mrf.mxu1 }
 0x278   :  { %v817_v47 = vadd.f32 %v1477_v45, %v1460_v44 }
 0x279   :  { %v713_v48 = vpop.f32.mrf.mxu0  ;;  %v811_v49 = vpop.f32.mrf.mxu1 }
 0x27a   :  { %v812_v51 = vadd.f32 %v811_v49, %v713_v48  ;;  %v846_v57 = vadd.f32 %v1268_v50, %v817_v47 }
 0x27b   :  { %v1463_v52 = vpop.f32.mrf.mxu0  ;;  %v1480_v53 = vpop.f32.mrf.mxu1 }
 0x27c   :  { %v845_v55 = vadd.f32 %v1268_v50, %v812_v51  ;;  %v827_v56 = vadd.f32 %v1480_v53, %v1463_v52 }
 0x27d   :  { %v723_v58 = vpop.f32.mrf.mxu0  ;;  %v821_v59 = vpop.f32.mrf.mxu1 }
 0x27e   :  { %v822_v61 = vadd.f32 %v821_v59, %v723_v58  ;;  %v851_v63 = vadd.f32 %v846_v57, %v845_v55  ;;  %v848_v2 = vadd.f32 %v1268_v50, %v827_v56  ;;  %v1081_v58 = vld [vmem:[%s2037_s1 + $0x108] sm:$0xff]  ;;  %v1080_v59 = vld [vmem:[%s2037_s1 + $0x100] sm:$0xff] }
 0x27f   :  { %v1466_v0 = vpop.f32.mrf.mxu0  ;;  %v1483_v1 = vpop.f32.mrf.mxu1 }
 0x280   :  { %v847_v3 = vadd.f32 %v1268_v50, %v822_v61  ;;  %v837_v4 = vadd.f32 %v1483_v1, %v1466_v0  ;;  %v854_v9 = vmul.f32 0.5, %v851_v63  ;;  %v1079_v61 = vld [vmem:[%s2037_s1 + $0xf8] sm:$0xff]  ;;  %v1078_v0 = vld [vmem:[%s2037_s1 + $0xf0] sm:$0xff] }
 0x281   :  { %v733_v6 = vpop.f32.mrf.mxu0  ;;  %v831_v7 = vpop.f32.mrf.mxu1 }
 0x282   :  { %v852_v8 = vadd.f32 %v848_v2, %v847_v3  ;;  %v832_v10 = vadd.f32 %v831_v7, %v733_v6  ;;  %v850_v32 = vadd.f32 %v1268_v50, %v837_v4  ;;  %v870_v14 = vmul.f32 %v854_v9, %v854_v9  ;;  %v1077_v2 = vld [vmem:[%s2037_s1 + $0xe8] sm:$0xff]  ;;  %v1076_v3 = vld [vmem:[%s2037_s1 + $0xe0] sm:$0xff]  ;;  %v1075_v4 = vld [vmem:[%s2037_s1 + $0xd8] sm:$0xff] }
 0x283   :  { %v858_v39 = vsel %vm857_vm4, %v854_v9, 0.0  ;;  %v1074_v7 = vld [vmem:[%s2037_s1 + $0xd0] sm:$0xff] }
 0x284   :  { %v855_v11 = vmul.f32 0.5, %v852_v8  ;;  %v849_v12 = vadd.f32 %v1268_v50, %v832_v10  ;;  %v873_v21 = vsel %vm857_vm4, %v870_v14, 0.0  ;;  %v1269_v50 = vld [vmem:[%s2038_s2 + $0x7] ss:$0 sm:$0xff]  ;;  %v1273_v14 = vld [vmem:[%s2038_s2 + $0x8] ss:$0 sm:$0xff] }
 0x286   :  { %v871_v13 = vmul.f32 %v855_v11, %v855_v11  ;;  %v859_v36 = vsel %vm857_vm4, %v855_v11, 0.0  ;;  %v853_v16 = vadd.f32 %v850_v32, %v849_v12 }
 0x287   :  { %v860_v18 = vadd.f32 %v859_v36, %v858_v39 }
 0x288   :  { %v874_v17 = vsel %vm857_vm4, %v871_v13, 0.0  ;;  %v856_v46 = vmul.f32 0.5, %v853_v16 }
 0x289   :  { %v875_v54 = vadd.f32 %v874_v17, %v873_v21 }
 0x28a   :  { %v861_v22 = vsel %vm857_vm4, %v856_v46, 0.0  ;;  %v872_v23 = vmul.f32 %v856_v46, %v856_v46 }
 0x28b   :  { %v862_v62 = vadd.f32 %v861_v22, %v860_v18 }
 0x28c   :  { %v876_v19 = vsel %vm857_vm4, %v872_v23, 0.0 }
 0x28d   :  { %v863_v20 = vrot.slane %v862_v62, 4  ;;  %v877_v25 = vadd.f32 %v876_v19, %v875_v54 }
 0x28f   :  { %v864_v26 = vadd.f32 %v863_v20, %v862_v62  ;;  %v878_v24 = vrot.slane %v877_v25, 4 }
 0x291   :  { %v865_v27 = vrot.slane %v864_v26, 2  ;;  %v879_v31 = vadd.f32 %v878_v24, %v877_v25 }
 0x293   :  { %v866_v28 = vadd.f32 %v865_v27, %v864_v26  ;;  %v880_v29 = vrot.slane %v879_v31, 2 }
 0x295   :  { %v867_v30 = vrot.slane %v866_v28, 1  ;;  %v881_v33 = vadd.f32 %v880_v29, %v879_v31 }
 0x297   :  { %v868_v34 = vadd.f32 %v867_v30, %v866_v28  ;;  %v882_v35 = vrot.slane %v881_v33, 1 }
 0x299   :  { %v869_v37 = vmul.f32 0.041666668, %v868_v34  ;;  %v883_v38 = vadd.f32 %v882_v35, %v881_v33  ;;  %v1184_v34 = vld [vmem:[%s2038_s2 + $0x9] sm:$0x1] }
 0x29b   :  { %v884_v40 = vmul.f32 0.041666668, %v883_v38  ;;  %v885_v15 = vmul.f32 %v869_v37, %v869_v37  ;;  %v892_v48 = vsub.f32 %v855_v11, %v869_v37  ;;  %v891_v49 = vsub.f32 %v854_v9, %v869_v37 }
 0x29c   :  { %v893_v63 = vsub.f32 %v856_v46, %v869_v37 }
 0x29d   :  { %v886_v41 = vsub.f32 %v884_v40, %v885_v15  ;;  %v1274_v15 = vld [vmem:[%s2038_s2 + $0xa] ss:$0 sm:$0xff] }
 0x29f   :  { %v887_v42 = vadd.f32 1e-05, %v886_v41 }
 0x2a1   :  { %1550 = vrsqrt.f32 %v887_v42 }
 0x2ae   :  { %v1551_v44 = vpop.eup %1550 }
 0x2af   :  { %v890_v45 = vmul.f32 %v1551_v44, %v889_v43  ;;  %v1275_v43 = vld [vmem:[%s2038_s2 + $0xb] ss:$0 sm:$0xff] }
 0x2b1   :  { %v897_v47 = vrot.slane %v890_v45, %v1871_v60 }
 0x2b3   :  { %v899_v51 = vmul.f32 %v897_v47, %v892_v48  ;;  %v898_v52 = vmul.f32 %v897_v47, %v891_v49  ;;  %v900_v1 = vmul.f32 %v897_v47, %v893_v63  ;;  %v1276_v48 = vld [vmem:[%s2038_s2 + $0xc] ss:$0 sm:$0xff] }
 0x2b5   :  { %v907_v53 = vadd.f32 %v1269_v50, %v899_v51  ;;  %v906_v55 = vadd.f32 %v1269_v50, %v898_v52  ;;  %v908_v6 = vadd.f32 %v1269_v50, %v900_v1 }
 0x2b7   :  { %v910_v56 = vmax.f32 %v907_v53, 0.0  ;;  %v909_v57 = vmax.f32 %v906_v55, 0.0  ;;  %v911_v8 = vmax.f32 %v908_v6, 0.0 }
 0x2b9   :  { %1501 = vmatmul.mubr.msk.f32.vlgmr.msra.gmra.mxu0 %vm857_vm4, %v910_v56  ;;  %1520 = vmatmul.mubr.msk.f32.vlgmr.msra.gmra.mxu1 %vm857_vm4, %v909_v57 }
 0x2ba   :  { %1523 = vmatpush3.msra.mxu0 %v1081_v58  ;;  %1538 = vmatprep.mubr.msk.f32.mxu0 %vm1556_vm0, %v1555_v5 }
 0x2bb   :  { %1524 = vmatprep.subr.mxu0 %v1555_v5 }
 0x2bc   :  { %1525 = vmatpush3.msra.mxu0 %v1080_v59 }
 0x2bd   :  { %1526 = vmatprep.subr.mxu0 %v1555_v5 }
 0x2be   :  { %1527 = vmatpush3.msra.mxu0 %v1079_v61 }
 0x2bf   :  { %1528 = vmatprep.subr.mxu0 %v1555_v5 }
 0x2c0   :  { %1529 = vmatpush3.msra.mxu0 %v1078_v0 }
 0x2c1   :  { %1530 = vmatprep.subr.mxu0 %v1555_v5 }
 0x2c2   :  { %1531 = vmatpush3.msra.mxu0 %v1077_v2 }
 0x2c3   :  { %1532 = vmatprep.subr.mxu0 %v1555_v5 }
 0x2c4   :  { %1533 = vmatpush3.msra.mxu0 %v1076_v3 }
 0x2c5   :  { %1534 = vmatprep.subr.mxu0 %v1555_v5 }
 0x2c6   :  { %1535 = vmatpush3.msra.mxu0 %v1075_v4 }
 0x2c7   :  { %1536 = vmatprep.subr.mxu0 %v1555_v5 }
 0x2c8   :  { %1537 = vmatpush3.msra.mxu0 %v1074_v7 }
 0x2c9   :  { %1539 = vmatmul.mubr.msk.f32.vlgmr.msra.gmra.mxu0 %vm857_vm4, %v911_v8 }
 0x379   :  { %v997_v9 = vpop.f32.mrf.mxu0  ;;  %v1070_v10 = vpop.f32.mrf.mxu1 }
 0x37a   :  { %v1071_v12 = vadd.f32 %v1070_v10, %v997_v9 }
 0x37b   :  { %v1502_v11 = vpop.f32.mrf.mxu0  ;;  %v1521_v32 = vpop.f32.mrf.mxu1 }
 0x389   :  { %v1151_v13 = vpop.f32.mrf.mxu0 }
 0x38a   :  { %v1155_v36 = vadd.f32 %v1151_v13, %v1071_v12 }
 0x38b   :  { %v1540_v16 = vpop.f32.mrf.mxu0 }
 0x38c   :  { %v1161_v39 = vadd.f32 %v1273_v14, %v1155_v36 }
 0x38e   :  { %v1163_v5 = vsel %vm1162_vm5, %v1161_v39, 0.0  ;;  %v1171_v17 = vmul.f32 %v1161_v39, %v1161_v39 }
 0x38f   :  { %v1164_v46 = vrot.slane %v1163_v5, 4 }
 0x390   :  { %v1172_v18 = vsel %vm1162_vm5, %v1171_v17, 0.0 }
 0x391   :  { %v1165_v21 = vadd.f32 %v1164_v46, %v1163_v5  ;;  %v1173_v22 = vrot.slane %v1172_v18, 4 }
 0x393   :  { %v1166_v23 = vrot.slane %v1165_v21, 2  ;;  %v1174_v54 = vadd.f32 %v1173_v22, %v1172_v18 }
 0x395   :  { %v1167_v62 = vadd.f32 %v1166_v23, %v1165_v21  ;;  %v1175_v19 = vrot.slane %v1174_v54, 2 }
 0x397   :  { %v1168_v20 = vrot.slane %v1167_v62, 1  ;;  %v1176_v25 = vadd.f32 %v1175_v19, %v1174_v54 }
 0x399   :  { %v1169_v26 = vadd.f32 %v1168_v20, %v1167_v62  ;;  %v1177_v24 = vrot.slane %v1176_v25, 1 }
 0x39b   :  { %v1170_v27 = vmul.f32 0.125, %v1169_v26  ;;  %v1178_v31 = vadd.f32 %v1177_v24, %v1176_v25 }
 0x39d   :  { %v1179_v28 = vmul.f32 0.125, %v1178_v31  ;;  %v1180_v29 = vmul.f32 %v1170_v27, %v1170_v27  ;;  %v1186_v38 = vsub.f32 %v1161_v39, %v1170_v27 }
 0x39f   :  { %v1181_v30 = vsub.f32 %v1179_v28, %v1180_v29 }
 0x3a1   :  { %v1182_v33 = vadd.f32 1e-05, %v1181_v30 }
 0x3a3   :  { %1552 = vrsqrt.f32 %v1182_v33 }
 0x3b0   :  { %v1553_v35 = vpop.eup %1552 }
 0x3b1   :  { %v1185_v37 = vmul.f32 %v1553_v35, %v1184_v34 }
 0x3b3   :  { %v1190_v40 = vrot.slane %v1185_v37, %v1871_v60 }
 0x3b5   :  { %v1191_v41 = vmul.f32 %v1190_v40, %v1186_v38 }
 0x3b7   :  { %v1197_v42 = vadd.f32 %v1274_v15, %v1191_v41 }
 0x3b9   :  { %v1198_v44 = vmax.f32 %v1197_v42, 0.0 }
 0x3bb   :  { %v1204_v45 = vmul.f32 %v1275_v43, %v1198_v44 }
 0x3bd   :  { %v1205_v47 = vsel %vm1162_vm5, %v1204_v45, 0.0 }
 0x3be   :  { %1206 = vadd.xlane.f32.xlu0 %v1205_v47 }
 0x447   :  { %v1207_v60 = vpop.xlane.xlu0 %1206 }
 0x448   :  { %v1213_v49 = vadd.f32 %v1276_v48, %v1207_v60 }
 0x44a   :  { %1215 = vst.msk [vmem:[%s2039_s3] sm:$0xff] %vm1214_vm6, %v1213_v49 }

</bundles_post_ra>
